<compile_context>
chip_gen: v5e
topology: v5e:2x2
jax: 0.10.0
libtpu: 0.0.40
codegen_flags: <defaults>
</compile_context>

<pallas_src>
import functools
from typing import NamedTuple

import jax
import jax.numpy as jnp
from jax.experimental import pallas as pl
from jax.experimental.pallas import tpu as pltpu

LANE = 128      # lane width: hidden/output feature dims padded to this
SUBLANE = 8     # sublane granularity for the batch dimension


def _round_up(x, m):
    return ((x + m - 1) // m) * m


def _vmem_capacity_bytes():
    """Generation-aware physical VMEM (v5e/v6e: 128 MiB, v7x: 64 MiB/TC)."""
    try:
        cap = int(pltpu.get_tpu_info().vmem_capacity_bytes)
        if cap > 0:
            return cap
    except Exception:
        pass
    return 64 << 20   # conservative fallback (v7x per-TensorCore)


def _is_multi_tensorcore_chip():
    """Best-effort v7x detection (2 TensorCores per chip)."""
    try:
        kind = jax.devices()[0].device_kind.lower()
    except Exception:
        return False
    return ("v7" in kind) or ("tpu7" in kind)


def _activation(h, name):
    # All of these satisfy act(0) == 0, so lane zero-padding stays exact.
    if name == "relu":
        return jnp.maximum(h, 0.0)
    if name == "tanh":
        return jnp.tanh(h)
    if name == "leaky_relu":
        return jnp.where(h >= 0.0, h, 0.01 * h)
    if name == "elu":
        return jnp.where(h >= 0.0, h, jnp.exp(jnp.minimum(h, 0.0)) - 1.0)
    raise ValueError(f"Unknown activation: {name}")


def _mlp_kernel(*refs, num_layers, activation):
    """refs = (x_ref, w0, b0, ..., wL, bL, out_ref); weights/biases lane-padded."""
    x_ref = refs[0]
    out_ref = refs[-1]
    param_refs = refs[1:-1]

    h = x_ref[...]                                    # (tile_b, in_dim) f32
    for layer in range(num_layers + 1):
        w_ref = param_refs[2 * layer]
        b_ref = param_refs[2 * layer + 1]
        # MXU operands in the weight dtype (bf16 by default), f32 accumulation,
        # f32 bias-add / activation on the VPU.
        h = jnp.dot(h.astype(w_ref.dtype), w_ref[...],
                    preferred_element_type=jnp.float32) + b_ref[...]
        if layer < num_layers:
            h = _activation(h, activation)
    # TODO(synk): training-mode dropout (pltpu.prng_random_bits mask with
    # 1/(1-p) scaling) not implemented; eval-mode dropout is identity.
    # Only out_dim (=2) of the 128 output lanes carry real logits; the
    # lane-dense slab keeps the store unmasked (wrapper slices [:, :2]).
    out_ref[...] = h.astype(out_ref.dtype)


class PreparedParams(NamedTuple):
    flat: tuple       # (w0, b0, w1, b1, ...) already padded + cast
    dims: tuple       # true feature dims: (input_dim, hidden, ..., hidden, 2)
    dims_p: tuple     # kernel feature dims: input dim unpadded, rest lane-padded
    num_layers: int
    activation: str


def prepare_params(params, num_layers, *, matmul_dtype=jnp.bfloat16,
                   activation="relu"):
    """Pad / cast weights ONCE (not per forward call)."""
    assert len(params) == num_layers + 1
    dims = tuple([params[0][0].shape[0]] + [w.shape[1] for (w, _) in params])
    # Hidden/output dims are padded to 128 lanes; the input contraction dim
    # stays unpadded so x can be fed to the kernel as-is.
    dims_p = (dims[0],) + tuple(_round_up(d, LANE) for d in dims[1:])
    flat = []
    for li, (w, b) in enumerate(params):
        di_p, do_p = dims_p[li], dims_p[li + 1]
        w_p = jnp.zeros((di_p, do_p), matmul_dtype)
        w_p = w_p.at[:w.shape[0], :w.shape[1]].set(w.astype(matmul_dtype))
        b_flat = b.astype(jnp.float32).reshape(1, -1)
        b_p = jnp.zeros((1, do_p), jnp.float32)
        b_p = b_p.at[:, :b_flat.shape[1]].set(b_flat)
        flat.extend([w_p, b_p])
    # Zero padding is exact: padded activation lanes hit zero weight rows,
    # padded bias lanes are zero, and activation(0) == 0.
    return PreparedParams(tuple(flat), dims, dims_p, num_layers, activation)


def mlp_forward(x, prepped, *, max_tile_b=2048):
    """x: (B, input_dim); prepped: PreparedParams.  Returns (B, 2) f32 logits."""
    B, in_dim = x.shape
    dims, dims_p = prepped.dims, prepped.dims_p
    assert in_dim == dims[0], (in_dim, dims)
    num_layers = prepped.num_layers
    out_dim, out_dim_p = dims[-1], dims_p[-1]
    w_itemsize = prepped.flat[0].dtype.itemsize

    # ---------------- VMEM budget / batch-tile sizing ----------------------
    capacity = _vmem_capacity_bytes()
    weight_bytes = sum(dims_p[i] * dims_p[i + 1] * w_itemsize + dims_p[i + 1] * 4
                       for i in range(num_layers + 1))
    # Bytes per batch row that scale with the tile: double-buffered x/out tiles
    # plus two live f32 activation slabs at a layer boundary.
    per_row = 4 * (2 * in_dim + 2 * out_dim_p + 2 * max(dims_p[1:]))

    budget = int(0.70 * capacity) - 2 * weight_bytes - (2 << 20)
    fit_rows = max(LANE, (max(budget, 0) // per_row) // LANE * LANE)
    tile_cap = max(SUBLANE, min(_round_up(max_tile_b, LANE), fit_rows))

    B_p = _round_up(B, SUBLANE)
    n_steps = pl.cdiv(B_p, tile_cap)
    if n_steps < 2 and B_p >= 1024 and _is_multi_tensorcore_chip():
        n_steps = 2          # v7x: give both TensorCores a batch tile
    if n_steps == 1:
        tile_b = B_p
    else:
        tile_b = _round_up(pl.cdiv(B_p, n_steps), LANE)
        n_steps = pl.cdiv(B_p, tile_b)
    B_grid = n_steps * tile_b

    # x stays feature-unpadded; batch rows are zero-padded only when needed
    # (no wrapper op at all for the common B % 8 == 0, single-tile case).
    xf = x if x.dtype == jnp.float32 else x.astype(jnp.float32)
    if B_grid != B:
        xf = jnp.zeros((B_grid, in_dim), jnp.float32).at[:B, :].set(xf)

    vmem_est = 2 * weight_bytes + tile_b * per_row + (2 << 20)
    compiler_kwargs = dict(dimension_semantics=("parallel",))
    if vmem_est > (16 << 20):   # above the smallest scoped default (v5e)
        compiler_kwargs["vmem_limit_bytes"] = int(
            max(16 << 20, min(vmem_est * 3 // 2, int(0.75 * capacity))))
    compiler_params = pltpu.CompilerParams(**compiler_kwargs)

    kernel = functools.partial(_mlp_kernel, num_layers=num_layers,
                               activation=prepped.activation)
    out_shape = jax.ShapeDtypeStruct((B_grid, out_dim_p), jnp.float32)

    def run(weight_mode):
        extra = {} if weight_mode is None else {"pipeline_mode": weight_mode}
        in_specs = [pl.BlockSpec((tile_b, in_dim), lambda i: (i, 0))]
        for li in range(num_layers + 1):
            in_specs.append(pl.BlockSpec((dims_p[li], dims_p[li + 1]),
                                         lambda i: (0, 0), **extra))
            in_specs.append(pl.BlockSpec((1, dims_p[li + 1]),
                                         lambda i: (0, 0), **extra))
        out_specs = pl.BlockSpec((tile_b, out_dim_p), lambda i: (i, 0))
        return pl.pallas_call(
            kernel,
            out_shape=out_shape,
            grid_spec=pltpu.PrefetchScalarGridSpec(
                num_scalar_prefetch=0,
                grid=(n_steps,),
                in_specs=in_specs,
                out_specs=out_specs,
            ),
            compiler_params=compiler_params,
        )(xf, *prepped.flat)

    try:
        # Weights/biases have a constant index_map across the batch grid, so a
        # single VMEM buffer suffices (halves weight VMEM at large hidden_dim).
        out_p = run(pl.Buffered(1))
    except Exception:
        out_p = run(None)   # fallback if pipeline_mode/Buffered is unsupported

    return out_p[:B, :out_dim]


def init_params(key, input_dim, hidden_dim, num_layers):
    """Deterministic init matching Net's layer sizes. W is (in, out)."""
    dims = [input_dim] + [hidden_dim] * num_layers + [2]
    params = []
    for i in range(len(dims) - 1):
        key, kw, kb = jax.random.split(key, 3)
        bound = 1.0 / float(dims[i]) ** 0.5
        w = jax.random.uniform(kw, (dims[i], dims[i + 1]),
                               minval=-bound, maxval=bound, dtype=jnp.float32)
        b = jax.random.uniform(kb, (1, dims[i + 1]),
                               minval=-bound, maxval=bound, dtype=jnp.float32)
        params.append((w, b))
    return params


def mlp_reference(x, params, activation="relu"):
    h = x.astype(jnp.float32)
    for i, (w, b) in enumerate(params):
        h = jnp.dot(h, w, precision=jax.lax.Precision.HIGHEST) + b.reshape(1, -1)
        if i < len(params) - 1:
            h = _activation(h, activation)
    return h


if __name__ == "__main__":
    # Net(input_dim=32, hidden_dim=32, num_layers=2, dropout_rate=0.1, 'relu')
    B, INPUT_DIM, HIDDEN_DIM, NUM_LAYERS = 16, 32, 32, 2

    key = jax.random.PRNGKey(0)
    key, kx = jax.random.split(key)
    x = jax.random.normal(kx, (B, INPUT_DIM), dtype=jnp.float32)
    params = init_params(key, INPUT_DIM, HIDDEN_DIM, NUM_LAYERS)
    ref = mlp_reference(x, params)

    # Default path: bf16 MXU operands, f32 accumulation / bias / ReLU.
    prepped = prepare_params(params, NUM_LAYERS)            # prepared once
    out = jax.block_until_ready(mlp_forward(x, prepped))
    assert out.shape == (B, 2), out.shape
    assert jnp.allclose(out, ref, atol=2e-2, rtol=2e-2), \
        float(jnp.max(jnp.abs(out - ref)))

    # Full-f32 matmul path.
    prepped_f32 = prepare_params(params, NUM_LAYERS, matmul_dtype=jnp.float32)
    out_f32 = jax.block_until_ready(mlp_forward(x, prepped_f32))
    assert jnp.allclose(out_f32, ref, atol=2e-2, rtol=2e-2), \
        float(jnp.max(jnp.abs(out_f32 - ref)))

    print("KERNEL_OK")
</pallas_src>

<mosaic_0001>
module attributes {stable_mosaic.version = 11 : i64} {
  func.func @_mlp_kernel(%arg0: i32, %arg1: memref<16x32xf32, #tpu.memory_space<vmem>>, %arg2: memref<32x128xbf16, #tpu.memory_space<vmem>>, %arg3: memref<1x128xf32, #tpu.memory_space<vmem>>, %arg4: memref<128x128xbf16, #tpu.memory_space<vmem>>, %arg5: memref<1x128xf32, #tpu.memory_space<vmem>>, %arg6: memref<128x128xbf16, #tpu.memory_space<vmem>>, %arg7: memref<1x128xf32, #tpu.memory_space<vmem>>, %arg8: memref<16x128xf32, #tpu.memory_space<vmem>>) attributes {dimension_semantics = [#tpu.dimension_semantics<parallel>], iteration_bounds = array<i64: 1>, scalar_prefetch = 0 : i64, scratch_operands = 0 : i64, tpu.core_type = #tpu.core_type<tc>, window_params = [{transform_indices = @transform_0, window_bounds = array<i64: 16, 32>}, {pipeline_mode = #tpu.pipeline_mode<synchronous>, transform_indices = @transform_1, window_bounds = array<i64: 32, 128>}, {pipeline_mode = #tpu.pipeline_mode<synchronous>, transform_indices = @transform_2, window_bounds = array<i64: 1, 128>}, {pipeline_mode = #tpu.pipeline_mode<synchronous>, transform_indices = @transform_3, window_bounds = array<i64: 128, 128>}, {pipeline_mode = #tpu.pipeline_mode<synchronous>, transform_indices = @transform_4, window_bounds = array<i64: 1, 128>}, {pipeline_mode = #tpu.pipeline_mode<synchronous>, transform_indices = @transform_5, window_bounds = array<i64: 128, 128>}, {pipeline_mode = #tpu.pipeline_mode<synchronous>, transform_indices = @transform_6, window_bounds = array<i64: 1, 128>}, {transform_indices = @transform_7, window_bounds = array<i64: 16, 128>}]} {
    %c0 = arith.constant 0 : index
    %c0_0 = arith.constant 0 : index
    %0 = vector.load %arg1[%c0, %c0_0] : memref<16x32xf32, #tpu.memory_space<vmem>>, vector<16x32xf32>
    %1 = arith.truncf %0 : vector<16x32xf32> to vector<16x32xbf16>
    %c0_1 = arith.constant 0 : index
    %c0_2 = arith.constant 0 : index
    %2 = vector.load %arg2[%c0_1, %c0_2] : memref<32x128xbf16, #tpu.memory_space<vmem>>, vector<32x128xbf16>
    %cst = arith.constant dense<0.000000e+00> : vector<16x128xf32>
    %3 = tpu.matmul %1, %2, %cst {dimension_numbers = #tpu.dot_dimension_numbers<[1], [0], [0], [1], [0, 0, 1, 1], [], []>} : vector<16x32xbf16>, vector<32x128xbf16>, vector<16x128xf32> -> vector<16x128xf32>
    %c0_3 = arith.constant 0 : index
    %c0_4 = arith.constant 0 : index
    %4 = vector.load %arg3[%c0_3, %c0_4] : memref<1x128xf32, #tpu.memory_space<vmem>>, vector<1x128xf32>
    %5 = vector.broadcast %4 : vector<1x128xf32> to vector<16x128xf32>
    %6 = arith.addf %3, %5 : vector<16x128xf32>
    %cst_5 = arith.constant 0.000000e+00 : f32
    %7 = vector.broadcast %cst_5 : f32 to vector<16x128xf32>
    %8 = arith.maximumf %6, %7 : vector<16x128xf32>
    %9 = arith.truncf %8 : vector<16x128xf32> to vector<16x128xbf16>
    %c0_6 = arith.constant 0 : index
    %c0_7 = arith.constant 0 : index
    %10 = vector.load %arg4[%c0_6, %c0_7] : memref<128x128xbf16, #tpu.memory_space<vmem>>, vector<128x128xbf16>
    %cst_8 = arith.constant dense<0.000000e+00> : vector<16x128xf32>
    %11 = tpu.matmul %9, %10, %cst_8 {dimension_numbers = #tpu.dot_dimension_numbers<[1], [0], [0], [1], [0, 0, 1, 1], [], []>} : vector<16x128xbf16>, vector<128x128xbf16>, vector<16x128xf32> -> vector<16x128xf32>
    %c0_9 = arith.constant 0 : index
    %c0_10 = arith.constant 0 : index
    %12 = vector.load %arg5[%c0_9, %c0_10] : memref<1x128xf32, #tpu.memory_space<vmem>>, vector<1x128xf32>
    %13 = vector.broadcast %12 : vector<1x128xf32> to vector<16x128xf32>
    %14 = arith.addf %11, %13 : vector<16x128xf32>
    %cst_11 = arith.constant 0.000000e+00 : f32
    %15 = vector.broadcast %cst_11 : f32 to vector<16x128xf32>
    %16 = arith.maximumf %14, %15 : vector<16x128xf32>
    %17 = arith.truncf %16 : vector<16x128xf32> to vector<16x128xbf16>
    %c0_12 = arith.constant 0 : index
    %c0_13 = arith.constant 0 : index
    %18 = vector.load %arg6[%c0_12, %c0_13] : memref<128x128xbf16, #tpu.memory_space<vmem>>, vector<128x128xbf16>
    %cst_14 = arith.constant dense<0.000000e+00> : vector<16x128xf32>
    %19 = tpu.matmul %17, %18, %cst_14 {dimension_numbers = #tpu.dot_dimension_numbers<[1], [0], [0], [1], [0, 0, 1, 1], [], []>} : vector<16x128xbf16>, vector<128x128xbf16>, vector<16x128xf32> -> vector<16x128xf32>
    %c0_15 = arith.constant 0 : index
    %c0_16 = arith.constant 0 : index
    %20 = vector.load %arg7[%c0_15, %c0_16] : memref<1x128xf32, #tpu.memory_space<vmem>>, vector<1x128xf32>
    %21 = vector.broadcast %20 : vector<1x128xf32> to vector<16x128xf32>
    %22 = arith.addf %19, %21 : vector<16x128xf32>
    %c0_17 = arith.constant 0 : index
    %c0_18 = arith.constant 0 : index
    %23 = vector.load %arg8[%c0_17, %c0_18] : memref<16x128xf32, #tpu.memory_space<vmem>>, vector<16x128xf32>
    tpu.vector_store %arg8[%c0_17, %c0_18], %22 {strides = array<i32>} : memref<16x128xf32, #tpu.memory_space<vmem>>, vector<16x128xf32>,
    return
  }
  func.func @transform_0(%arg0: i32) -> (i32, i32) {
    %c0_i32 = arith.constant 0 : i32
    %c0_i32_0 = arith.constant 0 : i32
    return %arg0, %c0_i32 : i32, i32
  }
  func.func @transform_1(%arg0: i32) -> (i32, i32) {
    %c0_i32 = arith.constant 0 : i32
    %c0_i32_0 = arith.constant 0 : i32
    %c0_i32_1 = arith.constant 0 : i32
    return %c0_i32, %c0_i32_0 : i32, i32
  }
  func.func @transform_2(%arg0: i32) -> (i32, i32) {
    %c0_i32 = arith.constant 0 : i32
    %c0_i32_0 = arith.constant 0 : i32
    %c0_i32_1 = arith.constant 0 : i32
    return %c0_i32, %c0_i32_0 : i32, i32
  }
  func.func @transform_3(%arg0: i32) -> (i32, i32) {
    %c0_i32 = arith.constant 0 : i32
    %c0_i32_0 = arith.constant 0 : i32
    %c0_i32_1 = arith.constant 0 : i32
    return %c0_i32, %c0_i32_0 : i32, i32
  }
  func.func @transform_4(%arg0: i32) -> (i32, i32) {
    %c0_i32 = arith.constant 0 : i32
    %c0_i32_0 = arith.constant 0 : i32
    %c0_i32_1 = arith.constant 0 : i32
    return %c0_i32, %c0_i32_0 : i32, i32
  }
  func.func @transform_5(%arg0: i32) -> (i32, i32) {
    %c0_i32 = arith.constant 0 : i32
    %c0_i32_0 = arith.constant 0 : i32
    %c0_i32_1 = arith.constant 0 : i32
    return %c0_i32, %c0_i32_0 : i32, i32
  }
  func.func @transform_6(%arg0: i32) -> (i32, i32) {
    %c0_i32 = arith.constant 0 : i32
    %c0_i32_0 = arith.constant 0 : i32
    %c0_i32_1 = arith.constant 0 : i32
    return %c0_i32, %c0_i32_0 : i32, i32
  }
  func.func @transform_7(%arg0: i32) -> (i32, i32) {
    %c0_i32 = arith.constant 0 : i32
    %c0_i32_0 = arith.constant 0 : i32
    return %arg0, %c0_i32 : i32, i32
  }
}

module attributes {stable_mosaic.version = 11 : i64} {
  func.func @_mlp_kernel(%arg0: i32, %arg1: memref<16x32xf32, #tpu.memory_space<vmem>>, %arg2: memref<32x128xbf16, #tpu.memory_space<vmem>>, %arg3: memref<1x128xf32, #tpu.memory_space<vmem>>, %arg4: memref<128x128xbf16, #tpu.memory_space<vmem>>, %arg5: memref<1x128xf32, #tpu.memory_space<vmem>>, %arg6: memref<128x128xbf16, #tpu.memory_space<vmem>>, %arg7: memref<1x128xf32, #tpu.memory_space<vmem>>, %arg8: memref<16x128xf32, #tpu.memory_space<vmem>>) attributes {dimension_semantics = [#tpu.dimension_semantics<parallel>], iteration_bounds = array<i64: 1>, scalar_prefetch = 0 : i64, scratch_operands = 0 : i64, tpu.core_type = #tpu.core_type<tc>, window_params = [{transform_indices = @transform_0, window_bounds = array<i64: 16, 32>}, {pipeline_mode = #tpu.pipeline_mode<synchronous>, transform_indices = @transform_1, window_bounds = array<i64: 32, 128>}, {pipeline_mode = #tpu.pipeline_mode<synchronous>, transform_indices = @transform_2, window_bounds = array<i64: 1, 128>}, {pipeline_mode = #tpu.pipeline_mode<synchronous>, transform_indices = @transform_3, window_bounds = array<i64: 128, 128>}, {pipeline_mode = #tpu.pipeline_mode<synchronous>, transform_indices = @transform_4, window_bounds = array<i64: 1, 128>}, {pipeline_mode = #tpu.pipeline_mode<synchronous>, transform_indices = @transform_5, window_bounds = array<i64: 128, 128>}, {pipeline_mode = #tpu.pipeline_mode<synchronous>, transform_indices = @transform_6, window_bounds = array<i64: 1, 128>}, {transform_indices = @transform_7, window_bounds = array<i64: 16, 128>}]} {
    %c0 = arith.constant 0 : index
    %c0_0 = arith.constant 0 : index
    %0 = vector.load %arg1[%c0, %c0_0] : memref<16x32xf32, #tpu.memory_space<vmem>>, vector<16x32xf32>
    %1 = arith.truncf %0 : vector<16x32xf32> to vector<16x32xbf16>
    %c0_1 = arith.constant 0 : index
    %c0_2 = arith.constant 0 : index
    %2 = vector.load %arg2[%c0_1, %c0_2] : memref<32x128xbf16, #tpu.memory_space<vmem>>, vector<32x128xbf16>
    %cst = arith.constant dense<0.000000e+00> : vector<16x128xf32>
    %3 = tpu.matmul %1, %2, %cst {dimension_numbers = #tpu.dot_dimension_numbers<[1], [0], [0], [1], [0, 0, 1, 1], [], []>} : vector<16x32xbf16>, vector<32x128xbf16>, vector<16x128xf32> -> vector<16x128xf32>
    %c0_3 = arith.constant 0 : index
    %c0_4 = arith.constant 0 : index
    %4 = vector.load %arg3[%c0_3, %c0_4] : memref<1x128xf32, #tpu.memory_space<vmem>>, vector<1x128xf32>
    %5 = vector.broadcast %4 : vector<1x128xf32> to vector<16x128xf32>
    %6 = arith.addf %3, %5 : vector<16x128xf32>
    %cst_5 = arith.constant 0.000000e+00 : f32
    %7 = vector.broadcast %cst_5 : f32 to vector<16x128xf32>
    %8 = arith.maximumf %6, %7 : vector<16x128xf32>
    %9 = arith.truncf %8 : vector<16x128xf32> to vector<16x128xbf16>
    %c0_6 = arith.constant 0 : index
    %c0_7 = arith.constant 0 : index
    %10 = vector.load %arg4[%c0_6, %c0_7] : memref<128x128xbf16, #tpu.memory_space<vmem>>, vector<128x128xbf16>
    %cst_8 = arith.constant dense<0.000000e+00> : vector<16x128xf32>
    %11 = tpu.matmul %9, %10, %cst_8 {dimension_numbers = #tpu.dot_dimension_numbers<[1], [0], [0], [1], [0, 0, 1, 1], [], []>} : vector<16x128xbf16>, vector<128x128xbf16>, vector<16x128xf32> -> vector<16x128xf32>
    %c0_9 = arith.constant 0 : index
    %c0_10 = arith.constant 0 : index
    %12 = vector.load %arg5[%c0_9, %c0_10] : memref<1x128xf32, #tpu.memory_space<vmem>>, vector<1x128xf32>
    %13 = vector.broadcast %12 : vector<1x128xf32> to vector<16x128xf32>
    %14 = arith.addf %11, %13 : vector<16x128xf32>
    %cst_11 = arith.constant 0.000000e+00 : f32
    %15 = vector.broadcast %cst_11 : f32 to vector<16x128xf32>
    %16 = arith.maximumf %14, %15 : vector<16x128xf32>
    %17 = arith.truncf %16 : vector<16x128xf32> to vector<16x128xbf16>
    %c0_12 = arith.constant 0 : index
    %c0_13 = arith.constant 0 : index
    %18 = vector.load %arg6[%c0_12, %c0_13] : memref<128x128xbf16, #tpu.memory_space<vmem>>, vector<128x128xbf16>
    %cst_14 = arith.constant dense<0.000000e+00> : vector<16x128xf32>
    %19 = tpu.matmul %17, %18, %cst_14 {dimension_numbers = #tpu.dot_dimension_numbers<[1], [0], [0], [1], [0, 0, 1, 1], [], []>} : vector<16x128xbf16>, vector<128x128xbf16>, vector<16x128xf32> -> vector<16x128xf32>
    %c0_15 = arith.constant 0 : index
    %c0_16 = arith.constant 0 : index
    %20 = vector.load %arg7[%c0_15, %c0_16] : memref<1x128xf32, #tpu.memory_space<vmem>>, vector<1x128xf32>
    %21 = vector.broadcast %20 : vector<1x128xf32> to vector<16x128xf32>
    %22 = arith.addf %19, %21 : vector<16x128xf32>
    %c0_17 = arith.constant 0 : index
    %c0_18 = arith.constant 0 : index
    %23 = vector.load %arg8[%c0_17, %c0_18] : memref<16x128xf32, #tpu.memory_space<vmem>>, vector<16x128xf32>
    tpu.vector_store %arg8[%c0_17, %c0_18], %22 {strides = array<i32>} : memref<16x128xf32, #tpu.memory_space<vmem>>, vector<16x128xf32>,
    return
  }
  func.func @transform_0(%arg0: i32) -> (i32, i32) {
    %c0_i32 = arith.constant 0 : i32
    %c0_i32_0 = arith.constant 0 : i32
    return %arg0, %c0_i32 : i32, i32
  }
  func.func @transform_1(%arg0: i32) -> (i32, i32) {
    %c0_i32 = arith.constant 0 : i32
    %c0_i32_0 = arith.constant 0 : i32
    %c0_i32_1 = arith.constant 0 : i32
    return %c0_i32, %c0_i32_0 : i32, i32
  }
  func.func @transform_2(%arg0: i32) -> (i32, i32) {
    %c0_i32 = arith.constant 0 : i32
    %c0_i32_0 = arith.constant 0 : i32
    %c0_i32_1 = arith.constant 0 : i32
    return %c0_i32, %c0_i32_0 : i32, i32
  }
  func.func @transform_3(%arg0: i32) -> (i32, i32) {
    %c0_i32 = arith.constant 0 : i32
    %c0_i32_0 = arith.constant 0 : i32
    %c0_i32_1 = arith.constant 0 : i32
    return %c0_i32, %c0_i32_0 : i32, i32
  }
  func.func @transform_4(%arg0: i32) -> (i32, i32) {
    %c0_i32 = arith.constant 0 : i32
    %c0_i32_0 = arith.constant 0 : i32
    %c0_i32_1 = arith.constant 0 : i32
    return %c0_i32, %c0_i32_0 : i32, i32
  }
  func.func @transform_5(%arg0: i32) -> (i32, i32) {
    %c0_i32 = arith.constant 0 : i32
    %c0_i32_0 = arith.constant 0 : i32
    %c0_i32_1 = arith.constant 0 : i32
    return %c0_i32, %c0_i32_0 : i32, i32
  }
  func.func @transform_6(%arg0: i32) -> (i32, i32) {
    %c0_i32 = arith.constant 0 : i32
    %c0_i32_0 = arith.constant 0 : i32
    %c0_i32_1 = arith.constant 0 : i32
    return %c0_i32, %c0_i32_0 : i32, i32
  }
  func.func @transform_7(%arg0: i32) -> (i32, i32) {
    %c0_i32 = arith.constant 0 : i32
    %c0_i32_0 = arith.constant 0 : i32
    return %arg0, %c0_i32 : i32, i32
  }
}

</mosaic_0001>

<bundles_post_ra>
// kernel: tpu_custom_call.1
= control target key start
LH: loop header
LB: loop body
LE: loop exit
PB: predicated region body
PF: predicated region fallthrough
CT: control target
= control target key end

     0   :  { %12 = vsyncpa [#allocation3], 0  ;;  %s635_s0 = inlined_call_operand.hbm [shape: f32[16,32], index: 0, kind: input, shape index: {}]   ;;  %s636_s1 = inlined_call_operand.hbm [shape: bf16[32,128], index: 1, kind: input, shape index: {}]   ;;  %s637_s2 = inlined_call_operand.vmem [shape: f32[1,128], index: 2, kind: input, shape index: {}]   ;;  %s638_s3 = inlined_call_operand.hbm [shape: bf16[128,128], index: 3, kind: input, shape index: {}]   ;;  %s639_s4 = inlined_call_operand.vmem [shape: f32[1,128], index: 4, kind: input, shape index: {}]   ;;  %s640_s5 = inlined_call_operand.hbm [shape: bf16[128,128], index: 5, kind: input, shape index: {}]   ;;  %s641_s6 = inlined_call_operand.vmem [shape: f32[1,128], index: 6, kind: input, shape index: {}]   ;;  %s642_s7 = inlined_call_operand.hbm [shape: f32[16,128], index: 7, kind: output, shape index: {}]  }
   0x1   :  { %13 = vsyncpa [#allocation6], 0 }
   0x2   :  { %14 = vsyncpa [#allocation9], 0  ;;  %s33_s26 = sshll.u32 %s636_s1, 4  ;;  %s34_s26 = int_to_ptr.hbm [resolvable:$true] %s33_s26 }
   0x3   :  { %15 = vsyncpa [#allocation4], 0  ;;  %s556_s27 = smov [#allocation5]   ;;  %s20_s8 = sshll.u32 %s635_s0, 4  ;;  %s21_s8 = int_to_ptr.hbm [resolvable:$true] %s20_s8 }
   0x4   :  { %s35_s28 = sshll.u32 %s556_s27, 4  ;;  %s557_s9 = smov 64   ;;  %s36_s28 = int_to_ptr.vmem [resolvable:$true] %s35_s28 }
   0x5   :  { %s558_s10 = smov 4   ;;  %s559_s11 = smov [#allocation2]  }
   0x6   :  { %41 = dma.hbm_to_vmem [thread:$0]  %s34_s26, 256, %s36_s28, [#allocation6], %s557_s9, %s557_s9, %s558_s10  }
   0x7   :  { %s22_s12 = sshll.u32 %s559_s11, 4  ;;  %s560_s13 = smov 128   ;;  %s23_s12 = int_to_ptr.vmem [resolvable:$true] %s22_s12 }
   0x8   :  { %s561_s14 = smov 8   ;;  %s48_s16 = sshll.u32 %s638_s3, 4  ;;  %s49_s16 = int_to_ptr.hbm [resolvable:$true] %s48_s16 }
   0x9   :  { %28 = dma.hbm_to_vmem [thread:$0]  %s21_s8, 256, %s23_s12, [#allocation3], %s560_s13, %s560_s13, %s561_s14  }
   0xa   :  { %s562_s17 = smov [#allocation7]   ;;  %s63_s20 = sshll.u32 %s640_s5, 4  ;;  %s64_s20 = int_to_ptr.hbm [resolvable:$true] %s63_s20 }
   0xb   :  { %s50_s0 = sshll.u32 %s562_s17, 4  ;;  %s563_s21 = smov [#allocation8]   ;;  %s51_s0 = int_to_ptr.vmem [resolvable:$true] %s50_s0 }
   0xc   :  { %56 = dma.hbm_to_vmem [thread:$0]  %s49_s16, 1024, %s51_s0, [#allocation6], %s557_s9, %s557_s9, %s558_s10  }
   0xd   :  { %s65_s22 = sshll.u32 %s563_s21, 4  ;;  %s66_s22 = int_to_ptr.vmem [resolvable:$true] %s65_s22 }
   0xe   :  { %71 = dma.hbm_to_vmem [thread:$0]  %s64_s20, 1024, %s66_s22, [#allocation9], %s557_s9, %s557_s9, %s558_s10  }
   0xf   :  { %548 = dma.done.wait [#allocation3], 256  }
  0x10   :  { %549 = vsyncadd [#allocation3], 4294967040 }
  0x11   :  { %550 = dma.done.wait [#allocation6], 1280  }
  0x12   :  { %551 = vsyncadd [#allocation6], 4294966016 }
  0x13   :  { %552 = dma.done.wait [#allocation9], 1024  }
  0x14   :  { %553 = vsyncadd [#allocation9], 4294966272  ;;  %v399_v0 = vld [vmem:[#allocation5 + $0x8] sm:$0xff]  ;;  %v398_v1 = vld [vmem:[#allocation5] sm:$0xff]  ;;  %vm114_vm0 = vcmask 261120   ;;  %s564_s26 = smov [#allocation10]  }
  0x15   :  { %v407_v2 = vld [vmem:[#allocation7 + $0x38] sm:$0xff]  ;;  %124 = vmatpush.bf16.msra.mxu0 %v399_v0  ;;  %v91_v3 = vld [vmem:[#allocation2] sm:$0xff]  ;;  %v92_v4 = vld [vmem:[#allocation2 + $0x8] sm:$0xff]  ;;  %s308_s27 = sshll.u32 %s564_s26, 4  ;;  %s309_s27 = int_to_ptr.vmem [resolvable:$true] %s308_s27 }
  0x16   :  { %203 = vmatpush.bf16.msra.mxu1 %v407_v2  ;;  %v406_v5 = vld [vmem:[#allocation7 + $0x30] sm:$0xff]  ;;  %v93_v6 = vpack.c.bf16 %v92_v4, %v91_v3  ;;  %v405_v7 = vld [vmem:[#allocation7 + $0x28] sm:$0xff]  ;;  %v404_v8 = vld [vmem:[#allocation7 + $0x20] sm:$0xff] }
  0x17   :  { %v403_v9 = vld [vmem:[#allocation7 + $0x18] sm:$0xff]  ;;  %v402_v10 = vld [vmem:[#allocation7 + $0x10] sm:$0xff]  ;;  %v401_v11 = vld [vmem:[#allocation7 + $0x8] sm:$0xff] }
  0x18   :  { %v400_v12 = vld [vmem:[#allocation7] sm:$0xff]  ;;  %v415_v13 = vld [vmem:[#allocation8 + $0x38] sm:$0xff]  ;;  %v414_v14 = vld [vmem:[#allocation8 + $0x30] sm:$0xff] }
  0x19   :  { %125 = vmatpush.bf16.msra.mxu0 %v398_v1  ;;  %288 = vmatpush.bf16.msra.mxu2 %v415_v13  ;;  %v413_v15 = vld [vmem:[#allocation8 + $0x28] sm:$0xff]  ;;  %v412_v16 = vld [vmem:[#allocation8 + $0x20] sm:$0xff]  ;;  %v411_v25 = vld [vmem:[#allocation8 + $0x18] sm:$0xff] }
  0x1a   :  { %204 = vmatpush.bf16.msra.mxu1 %v406_v5  ;;  %v425_v18 = vld [vmem:[%s637_s2] ss:$0 sm:$0xff]  ;;  %v410_v26 = vld [vmem:[#allocation8 + $0x10] sm:$0xff]  ;;  %v409_v27 = vld [vmem:[#allocation8 + $0x8] sm:$0xff] }
  0x1b   :  { %v408_v28 = vld [vmem:[#allocation8] sm:$0xff] }
  0x1c   :  { %333 = vmatmul.msk.bf16.vlgmr.msra.gmra.mxu0 %vm114_vm0, %v93_v6  ;;  %v426_v30 = vld [vmem:[%s639_s4] ss:$0 sm:$0xff]  ;;  %s310_s4 = sshll.u32 %s642_s7, 4  ;;  %s311_s4 = int_to_ptr.hbm [resolvable:$true] %s310_s4 }
  0x1d   :  { %289 = vmatpush.bf16.msra.mxu2 %v414_v14  ;;  %v427_v37 = vld [vmem:[%s641_s6] ss:$0 sm:$0xff] }
  0x1e   :  { %205 = vmatpush.bf16.msra.mxu1 %v405_v7 }
  0x21   :  { %290 = vmatpush.bf16.msra.mxu2 %v413_v15 }
  0x22   :  { %206 = vmatpush.bf16.msra.mxu1 %v404_v8 }
  0x25   :  { %291 = vmatpush.bf16.msra.mxu2 %v412_v16 }
  0x26   :  { %207 = vmatpush.bf16.msra.mxu1 %v403_v9 }
  0x29   :  { %292 = vmatpush.bf16.msra.mxu2 %v411_v25 }
  0x2a   :  { %208 = vmatpush.bf16.msra.mxu1 %v402_v10 }
  0x2d   :  { %293 = vmatpush.bf16.msra.mxu2 %v410_v26 }
  0x2e   :  { %209 = vmatpush.bf16.msra.mxu1 %v401_v11 }
  0x31   :  { %294 = vmatpush.bf16.msra.mxu2 %v409_v27 }
  0x32   :  { %210 = vmatpush.bf16.msra.mxu1 %v400_v12 }
  0x35   :  { %295 = vmatpush.bf16.msra.mxu2 %v408_v28 }
  0x99   :  { %v127_v17 = vpop.f32.mrf.mxu0 }
  0x9a   :  { %v128_v19 = vadd.f32 %v425_v18, %v127_v17 }
  0x9c   :  { %v132_v22 = vmax.f32 %v128_v19, 0.0 }
  0xa1   :  { %v129_v20 = vpop.f32.mrf.mxu0 }
  0xa2   :  { %v130_v21 = vadd.f32 %v425_v18, %v129_v20 }
  0xa4   :  { %v133_v23 = vmax.f32 %v130_v21, 0.0 }
  0xa6   :  { %v134_v24 = vpack.c.bf16 %v133_v23, %v132_v22 }
  0xa8   :  { %211 = vmatmul.bf16.vlgmr.msra.gmra.mxu1 %v134_v24 }
 0x125   :  { %v212_v29 = vpop.f32.mrf.mxu1 }
 0x126   :  { %v213_v31 = vadd.f32 %v426_v30, %v212_v29 }
 0x128   :  { %v217_v34 = vmax.f32 %v213_v31, 0.0 }
 0x12d   :  { %v214_v32 = vpop.f32.mrf.mxu1 }
 0x12e   :  { %v215_v33 = vadd.f32 %v426_v30, %v214_v32 }
 0x130   :  { %v218_v35 = vmax.f32 %v215_v33, 0.0 }
 0x132   :  { %v219_v36 = vpack.c.bf16 %v218_v35, %v217_v34 }
 0x134   :  { %296 = vmatmul.bf16.vlgmr.msra.gmra.mxu2 %v219_v36 }
 0x1b7   :  { %v297_v38 = vpop.f32.mrf.mxu2 }
 0x1b8   :  { %v298_v39 = vadd.f32 %v427_v37, %v297_v38 }
 0x1ba   :  { %302 = vst [vmem:[#allocation10] sm:$0xff] %v298_v39 }
 0x1bf   :  { %v299_v40 = vpop.f32.mrf.mxu2 }
 0x1c0   :  { %v300_v41 = vadd.f32 %v427_v37, %v299_v40 }
 0x1c2   :  { %303 = vst [vmem:[#allocation10 + $0x8] sm:$0xff] %v300_v41 }
 0x1c3   :  { %316 = dma.vmem_to_hbm [thread:$0]  %s309_s27, 256, %s311_s4, [#allocation4], %s560_s13, %s560_s13, %s561_s14  }
 0x1c4   :  { %554 = dma.done.wait [#allocation4], 256  }
 0x1c5   :  { %555 = vsyncadd [#allocation4], 4294967040 }
 0x1c6   :  { %321 = vsyncpa [#allocation3], 1 }
 0x1c7   :  { %322 = vsyncpa [#allocation6], 1 }
 0x1c8   :  { %323 = vsyncpa [#allocation9], 1 }
 0x1c9   :  { %324 = vsyncpa [#allocation4], 1 }

// kernel: tpu_custom_call.1
= control target key start
LH: loop header
LB: loop body
LE: loop exit
PB: predicated region body
PF: predicated region fallthrough
CT: control target
= control target key end

     0   :  { %12 = vsyncpa [#allocation3], 0  ;;  %s635_s0 = inlined_call_operand.hbm [shape: f32[16,32], index: 0, kind: input, shape index: {}]   ;;  %s636_s1 = inlined_call_operand.hbm [shape: bf16[32,128], index: 1, kind: input, shape index: {}]   ;;  %s637_s2 = inlined_call_operand.vmem [shape: f32[1,128], index: 2, kind: input, shape index: {}]   ;;  %s638_s3 = inlined_call_operand.hbm [shape: bf16[128,128], index: 3, kind: input, shape index: {}]   ;;  %s639_s4 = inlined_call_operand.vmem [shape: f32[1,128], index: 4, kind: input, shape index: {}]   ;;  %s640_s5 = inlined_call_operand.hbm [shape: bf16[128,128], index: 5, kind: input, shape index: {}]   ;;  %s641_s6 = inlined_call_operand.vmem [shape: f32[1,128], index: 6, kind: input, shape index: {}]   ;;  %s642_s7 = inlined_call_operand.hbm [shape: f32[16,128], index: 7, kind: output, shape index: {}]  }
   0x1   :  { %13 = vsyncpa [#allocation6], 0 }
   0x2   :  { %14 = vsyncpa [#allocation9], 0  ;;  %s33_s26 = sshll.u32 %s636_s1, 4  ;;  %s34_s26 = int_to_ptr.hbm [resolvable:$true] %s33_s26 }
   0x3   :  { %15 = vsyncpa [#allocation4], 0  ;;  %s556_s27 = smov [#allocation5]   ;;  %s20_s8 = sshll.u32 %s635_s0, 4  ;;  %s21_s8 = int_to_ptr.hbm [resolvable:$true] %s20_s8 }
   0x4   :  { %s35_s28 = sshll.u32 %s556_s27, 4  ;;  %s557_s9 = smov 64   ;;  %s36_s28 = int_to_ptr.vmem [resolvable:$true] %s35_s28 }
   0x5   :  { %s558_s10 = smov 4   ;;  %s559_s11 = smov [#allocation2]  }
   0x6   :  { %41 = dma.hbm_to_vmem [thread:$0]  %s34_s26, 256, %s36_s28, [#allocation6], %s557_s9, %s557_s9, %s558_s10  }
   0x7   :  { %s22_s12 = sshll.u32 %s559_s11, 4  ;;  %s560_s13 = smov 128   ;;  %s23_s12 = int_to_ptr.vmem [resolvable:$true] %s22_s12 }
   0x8   :  { %s561_s14 = smov 8   ;;  %s48_s16 = sshll.u32 %s638_s3, 4  ;;  %s49_s16 = int_to_ptr.hbm [resolvable:$true] %s48_s16 }
   0x9   :  { %28 = dma.hbm_to_vmem [thread:$0]  %s21_s8, 256, %s23_s12, [#allocation3], %s560_s13, %s560_s13, %s561_s14  }
   0xa   :  { %s562_s17 = smov [#allocation7]   ;;  %s63_s20 = sshll.u32 %s640_s5, 4  ;;  %s64_s20 = int_to_ptr.hbm [resolvable:$true] %s63_s20 }
   0xb   :  { %s50_s0 = sshll.u32 %s562_s17, 4  ;;  %s563_s21 = smov [#allocation8]   ;;  %s51_s0 = int_to_ptr.vmem [resolvable:$true] %s50_s0 }
   0xc   :  { %56 = dma.hbm_to_vmem [thread:$0]  %s49_s16, 1024, %s51_s0, [#allocation6], %s557_s9, %s557_s9, %s558_s10  }
   0xd   :  { %s65_s22 = sshll.u32 %s563_s21, 4  ;;  %s66_s22 = int_to_ptr.vmem [resolvable:$true] %s65_s22 }
   0xe   :  { %71 = dma.hbm_to_vmem [thread:$0]  %s64_s20, 1024, %s66_s22, [#allocation9], %s557_s9, %s557_s9, %s558_s10  }
   0xf   :  { %548 = dma.done.wait [#allocation3], 256  }
  0x10   :  { %549 = vsyncadd [#allocation3], 4294967040 }
  0x11   :  { %550 = dma.done.wait [#allocation6], 1280  }
  0x12   :  { %551 = vsyncadd [#allocation6], 4294966016 }
  0x13   :  { %552 = dma.done.wait [#allocation9], 1024  }
  0x14   :  { %553 = vsyncadd [#allocation9], 4294966272  ;;  %v399_v0 = vld [vmem:[#allocation5 + $0x8] sm:$0xff]  ;;  %v398_v1 = vld [vmem:[#allocation5] sm:$0xff]  ;;  %vm114_vm0 = vcmask 261120   ;;  %s564_s26 = smov [#allocation10]  }
  0x15   :  { %v407_v2 = vld [vmem:[#allocation7 + $0x38] sm:$0xff]  ;;  %124 = vmatpush.bf16.msra.mxu0 %v399_v0  ;;  %v91_v3 = vld [vmem:[#allocation2] sm:$0xff]  ;;  %v92_v4 = vld [vmem:[#allocation2 + $0x8] sm:$0xff]  ;;  %s308_s27 = sshll.u32 %s564_s26, 4  ;;  %s309_s27 = int_to_ptr.vmem [resolvable:$true] %s308_s27 }
  0x16   :  { %203 = vmatpush.bf16.msra.mxu1 %v407_v2  ;;  %v406_v5 = vld [vmem:[#allocation7 + $0x30] sm:$0xff]  ;;  %v93_v6 = vpack.c.bf16 %v92_v4, %v91_v3  ;;  %v405_v7 = vld [vmem:[#allocation7 + $0x28] sm:$0xff]  ;;  %v404_v8 = vld [vmem:[#allocation7 + $0x20] sm:$0xff] }
  0x17   :  { %v403_v9 = vld [vmem:[#allocation7 + $0x18] sm:$0xff]  ;;  %v402_v10 = vld [vmem:[#allocation7 + $0x10] sm:$0xff]  ;;  %v401_v11 = vld [vmem:[#allocation7 + $0x8] sm:$0xff] }
  0x18   :  { %v400_v12 = vld [vmem:[#allocation7] sm:$0xff]  ;;  %v415_v13 = vld [vmem:[#allocation8 + $0x38] sm:$0xff]  ;;  %v414_v14 = vld [vmem:[#allocation8 + $0x30] sm:$0xff] }
  0x19   :  { %125 = vmatpush.bf16.msra.mxu0 %v398_v1  ;;  %288 = vmatpush.bf16.msra.mxu2 %v415_v13  ;;  %v413_v15 = vld [vmem:[#allocation8 + $0x28] sm:$0xff]  ;;  %v412_v16 = vld [vmem:[#allocation8 + $0x20] sm:$0xff]  ;;  %v411_v25 = vld [vmem:[#allocation8 + $0x18] sm:$0xff] }
  0x1a   :  { %204 = vmatpush.bf16.msra.mxu1 %v406_v5  ;;  %v425_v18 = vld [vmem:[%s637_s2] ss:$0 sm:$0xff]  ;;  %v410_v26 = vld [vmem:[#allocation8 + $0x10] sm:$0xff]  ;;  %v409_v27 = vld [vmem:[#allocation8 + $0x8] sm:$0xff] }
  0x1b   :  { %v408_v28 = vld [vmem:[#allocation8] sm:$0xff] }
  0x1c   :  { %333 = vmatmul.msk.bf16.vlgmr.msra.gmra.mxu0 %vm114_vm0, %v93_v6  ;;  %v426_v30 = vld [vmem:[%s639_s4] ss:$0 sm:$0xff]  ;;  %s310_s4 = sshll.u32 %s642_s7, 4  ;;  %s311_s4 = int_to_ptr.hbm [resolvable:$true] %s310_s4 }
  0x1d   :  { %289 = vmatpush.bf16.msra.mxu2 %v414_v14  ;;  %v427_v37 = vld [vmem:[%s641_s6] ss:$0 sm:$0xff] }
  0x1e   :  { %205 = vmatpush.bf16.msra.mxu1 %v405_v7 }
  0x21   :  { %290 = vmatpush.bf16.msra.mxu2 %v413_v15 }
  0x22   :  { %206 = vmatpush.bf16.msra.mxu1 %v404_v8 }
  0x25   :  { %291 = vmatpush.bf16.msra.mxu2 %v412_v16 }
  0x26   :  { %207 = vmatpush.bf16.msra.mxu1 %v403_v9 }
  0x29   :  { %292 = vmatpush.bf16.msra.mxu2 %v411_v25 }
  0x2a   :  { %208 = vmatpush.bf16.msra.mxu1 %v402_v10 }
  0x2d   :  { %293 = vmatpush.bf16.msra.mxu2 %v410_v26 }
  0x2e   :  { %209 = vmatpush.bf16.msra.mxu1 %v401_v11 }
  0x31   :  { %294 = vmatpush.bf16.msra.mxu2 %v409_v27 }
  0x32   :  { %210 = vmatpush.bf16.msra.mxu1 %v400_v12 }
  0x35   :  { %295 = vmatpush.bf16.msra.mxu2 %v408_v28 }
  0x99   :  { %v127_v17 = vpop.f32.mrf.mxu0 }
  0x9a   :  { %v128_v19 = vadd.f32 %v425_v18, %v127_v17 }
  0x9c   :  { %v132_v22 = vmax.f32 %v128_v19, 0.0 }
  0xa1   :  { %v129_v20 = vpop.f32.mrf.mxu0 }
  0xa2   :  { %v130_v21 = vadd.f32 %v425_v18, %v129_v20 }
  0xa4   :  { %v133_v23 = vmax.f32 %v130_v21, 0.0 }
  0xa6   :  { %v134_v24 = vpack.c.bf16 %v133_v23, %v132_v22 }
  0xa8   :  { %211 = vmatmul.bf16.vlgmr.msra.gmra.mxu1 %v134_v24 }
 0x125   :  { %v212_v29 = vpop.f32.mrf.mxu1 }
 0x126   :  { %v213_v31 = vadd.f32 %v426_v30, %v212_v29 }
 0x128   :  { %v217_v34 = vmax.f32 %v213_v31, 0.0 }
 0x12d   :  { %v214_v32 = vpop.f32.mrf.mxu1 }
 0x12e   :  { %v215_v33 = vadd.f32 %v426_v30, %v214_v32 }
 0x130   :  { %v218_v35 = vmax.f32 %v215_v33, 0.0 }
 0x132   :  { %v219_v36 = vpack.c.bf16 %v218_v35, %v217_v34 }
 0x134   :  { %296 = vmatmul.bf16.vlgmr.msra.gmra.mxu2 %v219_v36 }
 0x1b7   :  { %v297_v38 = vpop.f32.mrf.mxu2 }
 0x1b8   :  { %v298_v39 = vadd.f32 %v427_v37, %v297_v38 }
 0x1ba   :  { %302 = vst [vmem:[#allocation10] sm:$0xff] %v298_v39 }
 0x1bf   :  { %v299_v40 = vpop.f32.mrf.mxu2 }
 0x1c0   :  { %v300_v41 = vadd.f32 %v427_v37, %v299_v40 }
 0x1c2   :  { %303 = vst [vmem:[#allocation10 + $0x8] sm:$0xff] %v300_v41 }
 0x1c3   :  { %316 = dma.vmem_to_hbm [thread:$0]  %s309_s27, 256, %s311_s4, [#allocation4], %s560_s13, %s560_s13, %s561_s14  }
 0x1c4   :  { %554 = dma.done.wait [#allocation4], 256  }
 0x1c5   :  { %555 = vsyncadd [#allocation4], 4294967040 }
 0x1c6   :  { %321 = vsyncpa [#allocation3], 1 }
 0x1c7   :  { %322 = vsyncpa [#allocation6], 1 }
 0x1c8   :  { %323 = vsyncpa [#allocation9], 1 }
 0x1c9   :  { %324 = vsyncpa [#allocation4], 1 }

</bundles_post_ra>
